<compile_context>
chip_gen: v7x
topology: tpu7x:2x2x1
jax: 0.10.0
libtpu: 0.0.40
codegen_flags: <defaults>
</compile_context>

<pallas_src>
import functools

import numpy as np
import jax
import jax.numpy as jnp
from jax.experimental import pallas as pl
from jax.experimental.pallas import tpu as pltpu

_LANE = 128
_NEG_BIG = -1e30


# ----------------------------- small helpers ---------------------------------


def _round_up(v, m):
    return ((v + m - 1) // m) * m


def _pad2d(x, rows, cols):
    r, c = x.shape
    return jnp.pad(x, ((0, rows - r), (0, cols - c)))


def _vmem_capacity_bytes():
    """Per-core VMEM capacity; conservative 64 MiB fallback (v7x per-TC)."""
    try:
        cap = getattr(pltpu.get_tpu_info(), "vmem_capacity_bytes", None)
        if cap:
            return int(cap)
    except Exception:
        pass
    return 64 * 1024 * 1024


def _default_tile():
    """256 tiles for the 2x256^2 MXU parts (v6e/v7x), 128 otherwise."""
    try:
        kind = jax.devices()[0].device_kind.lower()
    except Exception:
        return 128
    if "v6" in kind or "v7" in kind:
        return 256
    return 128


def _apply_finish(h, b_ref, w2_ref, o_ref, *, epilogue, valid_cols):
    """Finalize a finished f32 tile: bias, activation, optional fused W2 matmul."""
    h = h + b_ref[...]
    if epilogue == "relu":
        h = jnp.maximum(h, 0.0)
        if w2_ref is not None:
            # Fused layer-2 transform: Z2 tile = relu(H1 tile) @ W2 (resident).
            h = jnp.dot(h.astype(w2_ref.dtype), w2_ref[...],
                        preferred_element_type=jnp.float32)
    elif epilogue == "log_softmax":
        col = jax.lax.broadcasted_iota(jnp.int32, h.shape, 1)
        h = jnp.where(col < valid_cols, h, _NEG_BIG)      # mask padded class lanes
        m = jnp.max(h, axis=1, keepdims=True)
        s = h - m
        lse = jnp.log(jnp.sum(jnp.exp(s), axis=1, keepdims=True))
        h = s - lse
    o_ref[...] = h.astype(o_ref.dtype)


# ----------------------------- kernels ---------------------------------------


def _transform_kernel(x_ref, w_ref, o_ref):
    # Z = X @ W for one row tile; contraction (feature) dim fully resident.
    o_ref[...] = jnp.dot(x_ref[...], w_ref[...],
                         preferred_element_type=jnp.float32).astype(o_ref.dtype)


def _agg_onepass_kernel(a_ref, z_ref, b_ref, *rest, epilogue, valid_cols, fused):
    # One (tm, N_pad) row strip of A_hat against the fully VMEM-resident Z.
    if fused:
        w2_ref, o_ref = rest
    else:
        (o_ref,) = rest
        w2_ref = None
    h = jnp.dot(a_ref[...], z_ref[...], preferred_element_type=jnp.float32)
    _apply_finish(h, b_ref, w2_ref, o_ref, epilogue=epilogue, valid_cols=valid_cols)


def _agg_reduce_kernel(a_ref, z_ref, b_ref, *rest, epilogue, valid_cols, tk,
                       z_resident, fused):
    # grid = (row tiles, col tiles); reduction (col) axis last / "arbitrary".
    if fused:
        w2_ref, o_ref, acc_ref = rest
    else:
        o_ref, acc_ref = rest
        w2_ref = None
    k = pl.program_id(1)

    @pl.when(k == 0)
    def _():
        acc_ref[...] = jnp.zeros_like(acc_ref)

    if z_resident:
        # Z is DMA'd once (constant index map); slice the (tk, f) block locally.
        off = pl.multiple_of(k * tk, tk)
        z = z_ref[pl.ds(off, tk), :]
    else:
        z = z_ref[...]
    acc_ref[...] += jnp.dot(a_ref[...], z, preferred_element_type=jnp.float32)

    @pl.when(k == pl.num_programs(1) - 1)
    def _():
        _apply_finish(acc_ref[...], b_ref, w2_ref, o_ref,
                      epilogue=epilogue, valid_cols=valid_cols)


# ----------------------------- wrappers ---------------------------------------


def _transform(x, w, *, tm, vmem_limit):
    n_pad, f_in = x.shape
    f_out = w.shape[1]
    it = np.dtype(x.dtype).itemsize
    cost = pl.CostEstimate(
        flops=2 * n_pad * f_in * f_out,
        transcendentals=0,
        bytes_accessed=n_pad * f_in * it + f_in * f_out * it + n_pad * f_out * it)
    return pl.pallas_call(
        _transform_kernel,
        out_shape=jax.ShapeDtypeStruct((n_pad, f_out), x.dtype),
        grid_spec=pltpu.PrefetchScalarGridSpec(
            num_scalar_prefetch=0,
            grid=(n_pad // tm,),
            in_specs=[pl.BlockSpec((tm, f_in), lambda i: (i, 0)),
                      pl.BlockSpec((f_in, f_out), lambda i: (0, 0))],
            out_specs=pl.BlockSpec((tm, f_out), lambda i: (i, 0))),
        compiler_params=pltpu.CompilerParams(
            dimension_semantics=("parallel",),
            vmem_limit_bytes=vmem_limit),
        cost_estimate=cost,
    )(x, w)


def _aggregate(a, z, b, *, tm, tk, epilogue, valid_cols, out_dtype,
               w_fused, vmem_limit, budget, force_mode=None):
    n_pad = a.shape[0]
    f = z.shape[1]
    f_out = w_fused.shape[1] if w_fused is not None else f
    fused = w_fused is not None

    a_it = np.dtype(a.dtype).itemsize
    z_it = np.dtype(z.dtype).itemsize
    o_it = np.dtype(out_dtype).itemsize
    small = 2 * f * 4 + (2 * f * f_out * 2 if fused else 0)   # bias + resident W2

    # VMEM estimates count the default 2x buffering of every operand/output.
    onepass_est = (2 * tm * n_pad * a_it + 2 * n_pad * f * z_it
                   + 2 * tm * f_out * o_it + small)
    resident_est = (2 * tm * tk * a_it + 2 * n_pad * f * z_it
                    + 2 * tm * f_out * o_it + tm * f * 4 + small)

    if force_mode is not None:
        mode = force_mode
    elif onepass_est <= budget:
        mode = "onepass"                 # Z + full A row strip fit: Z read once
    elif resident_est <= budget:
        mode = "reduce_resident"         # Z still resident, A streamed as tiles
    else:
        mode = "reduce_stream"           # very large N: stream both A and Z
    assert mode in ("onepass", "reduce_resident", "reduce_stream"), mode

    flops = 2 * n_pad * n_pad * f + (2 * n_pad * f * f_out if fused else 0)
    trans = n_pad * f_out if epilogue == "log_softmax" else 0
    bytes_acc = (n_pad * n_pad * a_it + n_pad * f * z_it
                 + n_pad * f_out * o_it + small)
    cost = pl.CostEstimate(flops=flops, transcendentals=trans,
                           bytes_accessed=bytes_acc)

    operands = [a, z, b]

    if mode == "onepass":
        in_specs = [pl.BlockSpec((tm, n_pad), lambda i: (i, 0)),
                    pl.BlockSpec((n_pad, f), lambda i: (0, 0)),
                    pl.BlockSpec((1, f), lambda i: (0, 0))]
        if fused:
            in_specs.append(pl.BlockSpec((f, f_out), lambda i: (0, 0)))
            operands.append(w_fused)
        kernel = functools.partial(_agg_onepass_kernel, epilogue=epilogue,
                                   valid_cols=valid_cols, fused=fused)
        grid_spec = pltpu.PrefetchScalarGridSpec(
            num_scalar_prefetch=0,
            grid=(n_pad // tm,),
            in_specs=in_specs,
            out_specs=pl.BlockSpec((tm, f_out), lambda i: (i, 0)))
        dims = ("parallel",)
    else:
        z_resident = (mode == "reduce_resident")
        if z_resident:
            z_spec = pl.BlockSpec((n_pad, f), lambda i, k: (0, 0))
        else:
            z_spec = pl.BlockSpec((tk, f), lambda i, k: (k, 0))
        in_specs = [pl.BlockSpec((tm, tk), lambda i, k: (i, k)),
                    z_spec,
                    pl.BlockSpec((1, f), lambda i, k: (0, 0))]
        if fused:
            in_specs.append(pl.BlockSpec((f, f_out), lambda i, k: (0, 0)))
            operands.append(w_fused)
        kernel = functools.partial(_agg_reduce_kernel, epilogue=epilogue,
                                   valid_cols=valid_cols, tk=tk,
                                   z_resident=z_resident, fused=fused)
        grid_spec = pltpu.PrefetchScalarGridSpec(
            num_scalar_prefetch=0,
            grid=(n_pad // tm, n_pad // tk),
            in_specs=in_specs,
            out_specs=pl.BlockSpec((tm, f_out), lambda i, k: (i, 0)),
            scratch_shapes=[pltpu.VMEM((tm, f), jnp.float32)])
        dims = ("parallel", "arbitrary")

    return pl.pallas_call(
        kernel,
        out_shape=jax.ShapeDtypeStruct((n_pad, f_out), out_dtype),
        grid_spec=grid_spec,
        compiler_params=pltpu.CompilerParams(
            dimension_semantics=dims,
            vmem_limit_bytes=vmem_limit),
        cost_estimate=cost,
    )(*operands)


def gcn_forward(a_hat, x, w1, b1, w2, b2, *, tile=None,
                stream_dtype=jnp.bfloat16, force_mode=None):
    n, in_dim = x.shape
    hid_dim = w1.shape[1]
    out_dim = w2.shape[1]

    # Pad N at 128 granularity (quadratic in A_hat!) and only use 256-tiles when
    # they divide evenly.
    n_pad = _round_up(n, _LANE)
    in_pad = _round_up(in_dim, _LANE)
    hid_pad = _round_up(hid_dim, _LANE)
    out_pad = _round_up(out_dim, _LANE)

    tile_pref = tile if tile is not None else _default_tile()
    tm = tile_pref if n_pad % tile_pref == 0 else 128
    tk = tm
    tm_transform = max(d for d in (1024, 512, 256, 128) if n_pad % d == 0)

    vmem_cap = _vmem_capacity_bytes()
    vmem_limit = (vmem_cap * 3) // 4          # ~48 MiB on v7x, ~96 MiB on v5e/v6e
    budget = vmem_cap // 2                    # single-pass / resident-Z threshold

    # TODO(synk): A_hat is streamed as bf16; keep f32 (or add per-row scaling)
    # for very high-degree graphs if normalization precision becomes an issue.
    a_p = _pad2d(a_hat, n_pad, n_pad).astype(stream_dtype)
    x_p = _pad2d(x, n_pad, in_pad).astype(stream_dtype)
    w1_p = _pad2d(w1, in_pad, hid_pad).astype(stream_dtype)
    w2_p = _pad2d(w2, hid_pad, out_pad).astype(stream_dtype)
    b1_p = _pad2d(b1.reshape(1, -1), 1, hid_pad).astype(jnp.float32)
    b2_p = _pad2d(b2.reshape(1, -1), 1, out_pad).astype(jnp.float32)

    # Stage 1: Z1 = X @ W1 (fat row tiles, W1 resident).
    z1 = _transform(x_p, w1_p, tm=tm_transform, vmem_limit=vmem_limit)

    # Stage 2 (fused): Z2 = relu(A_hat @ Z1 + b1) @ W2
    # (layer-2 transform fused into the layer-1 aggregate finalize).
    z2 = _aggregate(a_p, z1, b1_p, tm=tm, tk=tk, epilogue="relu",
                    valid_cols=hid_dim, out_dtype=stream_dtype, w_fused=w2_p,
                    vmem_limit=vmem_limit, budget=budget, force_mode=force_mode)

    # TODO(synk): F.dropout(p=0.5, training=True) is stochastic; eval-mode
    # (identity) semantics are implemented here.

    # Stage 3: log_softmax(A_hat @ Z2 + b2, dim=1).
    logp = _aggregate(a_p, z2, b2_p, tm=tm, tk=tk, epilogue="log_softmax",
                      valid_cols=out_dim, out_dtype=jnp.float32, w_fused=None,
                      vmem_limit=vmem_limit, budget=budget, force_mode=force_mode)
    return logp[:n, :out_dim]


# ----------------------------- glue / reference -------------------------------


def build_normalized_adjacency(edge_index, num_nodes):
    """Dense GCN normalization: A_hat = D^{-1/2} (A + I) D^{-1/2}.

    edge_index: [2, E] int32; row 0 = source, row 1 = target.
    A[t, s] = 1 for each edge s -> t so A_hat @ X aggregates from sources.
    The diagonal is *set* (not added) to 1 so explicit self-loops are not
    double-counted.
    """
    src, dst = edge_index[0], edge_index[1]
    a = jnp.zeros((num_nodes, num_nodes), jnp.float32)
    a = a.at[dst, src].set(1.0)
    idx = jnp.arange(num_nodes)
    a = a.at[idx, idx].set(1.0)
    deg = jnp.sum(a, axis=1)
    dinv = jnp.where(deg > 0, 1.0 / jnp.sqrt(deg), 0.0)
    return dinv[:, None] * a * dinv[None, :]


def reference_forward(a_hat, x, w1, b1, w2, b2, stream_dtype=jnp.bfloat16):
    """Plain-JAX reference mirroring the kernel's bf16 streaming / f32 accumulation."""
    dt = stream_dtype
    a = a_hat.astype(dt)
    z1 = jnp.dot(x.astype(dt), w1.astype(dt),
                 preferred_element_type=jnp.float32).astype(dt)
    h1 = jnp.maximum(jnp.dot(a, z1, preferred_element_type=jnp.float32) + b1,
                     0.0).astype(dt)
    z2 = jnp.dot(h1, w2.astype(dt),
                 preferred_element_type=jnp.float32).astype(dt)
    h2 = jnp.dot(a, z2, preferred_element_type=jnp.float32) + b2
    return jax.nn.log_softmax(h2, axis=1)


if __name__ == "__main__":
    # Small graph, but large enough to exercise the tiled / reduction grids.
    N, E = 256, 1024
    in_dim, hid_dim, out_dim = 16, 32, 8

    key = jax.random.PRNGKey(0)
    kx, ke1, ke2, kw1, kw2, kb1, kb2 = jax.random.split(key, 7)

    x = jax.random.normal(kx, (N, in_dim), jnp.float32)
    src = jax.random.randint(ke1, (E,), 0, N, jnp.int32)
    dst = jax.random.randint(ke2, (E,), 0, N, jnp.int32)
    edge_index = jnp.stack([src, dst], axis=0)                 # [2, E]

    w1 = jax.random.normal(kw1, (in_dim, hid_dim), jnp.float32) / jnp.sqrt(in_dim)
    b1 = 0.1 * jax.random.normal(kb1, (1, hid_dim), jnp.float32)
    w2 = jax.random.normal(kw2, (hid_dim, out_dim), jnp.float32) / jnp.sqrt(hid_dim)
    b2 = 0.1 * jax.random.normal(kb2, (1, out_dim), jnp.float32)

    a_hat = build_normalized_adjacency(edge_index, N)
    ref = reference_forward(a_hat, x, w1, b1, w2, b2)

    # Auto path (single-pass row strips; Z fetched from HBM exactly once).
    out_auto = jax.block_until_ready(gcn_forward(a_hat, x, w1, b1, w2, b2))
    # Reduction grid with resident Z (large-N path), forced for coverage.
    out_res = jax.block_until_ready(
        gcn_forward(a_hat, x, w1, b1, w2, b2, tile=128,
                    force_mode="reduce_resident"))
    # Reduction grid with streamed Z (very-large-N fallback), forced for coverage.
    out_str = jax.block_until_ready(
        gcn_forward(a_hat, x, w1, b1, w2, b2, tile=128,
                    force_mode="reduce_stream"))

    for name, out in (("onepass", out_auto), ("reduce_resident", out_res),
                      ("reduce_stream", out_str)):
        assert out.shape == (N, out_dim), (name, out.shape)
        assert jnp.allclose(out, ref, atol=5e-3, rtol=5e-3), f"{name} mismatch"

    print("KERNEL_OK")
</pallas_src>

<mosaic_0001>
module attributes {stable_mosaic.version = 11 : i64} {
  func.func @_transform_kernel(%arg0: i32, %arg1: memref<256x128xbf16, #tpu.memory_space<vmem>>, %arg2: memref<128x128xbf16, #tpu.memory_space<vmem>>, %arg3: memref<256x128xbf16, #tpu.memory_space<vmem>>) attributes {dimension_semantics = [#tpu.dimension_semantics<parallel>], iteration_bounds = array<i64: 1>, scalar_prefetch = 0 : i64, scratch_operands = 0 : i64, tpu.core_type = #tpu.core_type<tc>, window_params = [{transform_indices = @transform_0, window_bounds = array<i64: 256, 128>}, {pipeline_mode = #tpu.pipeline_mode<synchronous>, transform_indices = @transform_1, window_bounds = array<i64: 128, 128>}, {transform_indices = @transform_2, window_bounds = array<i64: 256, 128>}]} {
    %c0 = arith.constant 0 : index
    %c0_0 = arith.constant 0 : index
    %0 = vector.load %arg1[%c0, %c0_0] : memref<256x128xbf16, #tpu.memory_space<vmem>>, vector<256x128xbf16>
    %c0_1 = arith.constant 0 : index
    %c0_2 = arith.constant 0 : index
    %1 = vector.load %arg2[%c0_1, %c0_2] : memref<128x128xbf16, #tpu.memory_space<vmem>>, vector<128x128xbf16>
    %cst = arith.constant dense<0.000000e+00> : vector<256x128xf32>
    %2 = tpu.matmul %0, %1, %cst {dimension_numbers = #tpu.dot_dimension_numbers<[1], [0], [0], [1], [0, 0, 1, 1], [], []>} : vector<256x128xbf16>, vector<128x128xbf16>, vector<256x128xf32> -> vector<256x128xf32>
    %3 = arith.truncf %2 : vector<256x128xf32> to vector<256x128xbf16>
    %c0_3 = arith.constant 0 : index
    %c0_4 = arith.constant 0 : index
    %4 = vector.load %arg3[%c0_3, %c0_4] : memref<256x128xbf16, #tpu.memory_space<vmem>>, vector<256x128xbf16>
    tpu.vector_store %arg3[%c0_3, %c0_4], %3 {strides = array<i32>} : memref<256x128xbf16, #tpu.memory_space<vmem>>, vector<256x128xbf16>,
    return
  }
  func.func @transform_0(%arg0: i32) -> (i32, i32) {
    %c0_i32 = arith.constant 0 : i32
    %c0_i32_0 = arith.constant 0 : i32
    return %arg0, %c0_i32 : i32, i32
  }
  func.func @transform_1(%arg0: i32) -> (i32, i32) {
    %c0_i32 = arith.constant 0 : i32
    %c0_i32_0 = arith.constant 0 : i32
    %c0_i32_1 = arith.constant 0 : i32
    return %c0_i32, %c0_i32_0 : i32, i32
  }
  func.func @transform_2(%arg0: i32) -> (i32, i32) {
    %c0_i32 = arith.constant 0 : i32
    %c0_i32_0 = arith.constant 0 : i32
    return %arg0, %c0_i32 : i32, i32
  }
}

</mosaic_0001>

<bundles_post_ra>
// kernel: tpu_custom_call.1
= control target key start
LH: loop header
LB: loop body
LE: loop exit
PB: predicated region body
PF: predicated region fallthrough
CT: control target
= control target key end

     0   :  { %7 = vsyncpa [#allocation3], 0  ;;  %s1009_s0 = inlined_call_operand.hbm [shape: bf16[256,128], index: 0, kind: input, shape index: {}]   ;;  %s1010_s1 = inlined_call_operand.hbm [shape: bf16[128,128], index: 1, kind: input, shape index: {}]   ;;  %s1011_s2 = inlined_call_operand.hbm [shape: bf16[256,128], index: 2, kind: output, shape index: {}]  }
   0x1   :  { %8 = vsyncpa [#allocation6], 0 }
   0x2   :  { %9 = vsyncpa [#allocation4], 0  ;;  %s944_s9 = smov [#allocation2]   ;;  %s872_s13 = scalar_lea.hbm %s1009_s0, 2048 }
   0x3   :  { %s15_s10 = sshll.u32 %s944_s9, 4  ;;  %p873_p0 = scmp.ne.s32.totalorder %s1009_s0, %s872_s13  ;;  %s16_s10 = int_to_ptr.vmem [resolvable:$true] %s15_s10 }
   0x4   :  { %p876_p1 = scmp.lt.u32.totalorder %s872_s13, %s1009_s0 }
   0x6   :  { %p878_p2 = pnand %p876_p1, %p873_p0 }
   0x8   :  { %881 = shalt.err (!%p878_p2)
}
   0x9   :  { %s882_s18 = scalar_lea.vmem %s16_s10, 2048  ;;  %p887_p4 = scmp.lt.s32.totalorder %s16_s10, %s16_s10 }
   0xa   :  { %p883_p3 = scmp.ne.s32.totalorder %s16_s10, %s882_s18  ;;  %p888_p5 = scmp.lt.s32.totalorder %s882_s18, %s882_s18 }
   0xc   :  { %p889_p6 = por %p888_p5, %p887_p4 }
   0xe   :  { %p890_p7 = pnand %p889_p6, %p883_p3 }
  0x10   :  { %893 = shalt.err (!%p890_p7)
}
  0x11   :  { %s945_s19 = smov 64   ;;  %s946_s20 = smov 4  }
  0x12   :  { %21 = dma.hbm_to_vmem [thread:$0]  %s1009_s0, 2048, %s16_s10, [#allocation3], %s945_s19, %s945_s19, %s946_s20  }
  0x13   :  { %s947_s23 = smov [#allocation5]   ;;  %s894_s27 = scalar_lea.hbm %s1010_s1, 1024 }
  0x14   :  { %s27_s24 = sshll.u32 %s947_s23, 4  ;;  %p895_p8 = scmp.ne.s32.totalorder %s1010_s1, %s894_s27  ;;  %s28_s24 = int_to_ptr.vmem [resolvable:$true] %s27_s24 }
  0x15   :  { %p898_p9 = scmp.lt.u32.totalorder %s894_s27, %s1010_s1 }
  0x17   :  { %p900_p10 = pnand %p898_p9, %p895_p8 }
  0x19   :  { %903 = shalt.err (!%p900_p10)
}
  0x1a   :  { %s904_s4 = scalar_lea.vmem %s28_s24, 1024  ;;  %p909_p12 = scmp.lt.s32.totalorder %s28_s24, %s28_s24 }
  0x1b   :  { %p905_p11 = scmp.ne.s32.totalorder %s28_s24, %s904_s4  ;;  %p910_p13 = scmp.lt.s32.totalorder %s904_s4, %s904_s4 }
  0x1d   :  { %p911_p0 = por %p910_p13, %p909_p12 }
  0x1f   :  { %p912_p1 = pnand %p911_p0, %p905_p11 }
  0x21   :  { %915 = shalt.err (!%p912_p1)
}
  0x22   :  { %33 = dma.hbm_to_vmem [thread:$0]  %s1010_s1, 1024, %s28_s24, [#allocation6], %s945_s19, %s945_s19, %s946_s20  }
  0x23   :  { %938 = dma.done.wait [#allocation3], 2048  }
  0x24   :  { %939 = vsyncadd [#allocation3], 4294965248 }
  0x25   :  { %940 = dma.done.wait [#allocation6], 1024  }
  0x26   :  { %941 = vsyncadd [#allocation6], 4294966272  ;;  %v848_v0 = vld [vmem:[#allocation5] sm:$0xff]   ;;  %v849_v1 = vld [vmem:[#allocation5 + $0x8] sm:$0xff]   ;;  %s948_s1 = smov [#allocation7]  }
  0x27   :  { %779 = vmatprep.subr.bf16.mxu0 %v848_v0  ;;  %827 = vmatprep.subr.bf16.mxu1 %v848_v0  ;;  %v850_v2 = vld [vmem:[#allocation5 + $0x10] sm:$0xff]   ;;  %v851_v3 = vld [vmem:[#allocation5 + $0x18] sm:$0xff]   ;;  %v856_v4 = vld [vmem:[#allocation2] sm:$0xff]   ;;  %s559_s6 = sshll.u32 %s948_s1, 4  ;;  %s560_s6 = int_to_ptr.vmem [resolvable:$true] %s559_s6 }
  0x28   :  { %780 = vmatpush3.bf16.msra.mxu0 %v848_v0  ;;  %835 = vmatpush3.bf16.msra.mxu1 %v848_v0  ;;  %v857_v5 = vld [vmem:[#allocation2 + $0x40] sm:$0xff]   ;;  %v853_v7 = vld [vmem:[#allocation5 + $0x28] sm:$0xff]   ;;  %v854_v8 = vld [vmem:[#allocation5 + $0x30] sm:$0xff]   ;;  %s916_s7 = scalar_lea.vmem %s560_s6, 2048  ;;  %p921_p3 = scmp.lt.s32.totalorder %s560_s6, %s560_s6 }
  0x29   :  { %781 = vmatprep.subr.bf16.mxu0 %v849_v1  ;;  %828 = vmatprep.subr.bf16.mxu1 %v849_v1  ;;  %v852_v6 = vld [vmem:[#allocation5 + $0x20] sm:$0xff]   ;;  %v855_v9 = vld [vmem:[#allocation5 + $0x38] sm:$0xff]   ;;  %v858_v10 = vld [vmem:[#allocation2 + $0x8] sm:$0xff]   ;;  %p917_p2 = scmp.ne.s32.totalorder %s560_s6, %s916_s7  ;;  %p922_p4 = scmp.lt.s32.totalorder %s916_s7, %s916_s7 }
  0x2a   :  { %795 = vmatprep.mubr.bf16.mxu0 %v856_v4  ;;  %811 = vmatprep.mubr.bf16.mxu1 %v857_v5  ;;  %v859_v11 = vld [vmem:[#allocation2 + $0x48] sm:$0xff]   ;;  %v860_v12 = vld [vmem:[#allocation2 + $0x10] sm:$0xff]   ;;  %v862_v14 = vld [vmem:[#allocation2 + $0x18] sm:$0xff]  }
  0x2b   :  { %v861_v13 = vld [vmem:[#allocation2 + $0x50] sm:$0xff]   ;;  %v863_v15 = vld [vmem:[#allocation2 + $0x58] sm:$0xff]   ;;  %v864_v16 = vld [vmem:[#allocation2 + $0x20] sm:$0xff]   ;;  %p923_p5 = por %p922_p4, %p921_p3 }
  0x2c   :  { %782 = vmatpush3.bf16.msra.mxu0 %v849_v1  ;;  %836 = vmatpush3.bf16.msra.mxu1 %v849_v1  ;;  %v865_v17 = vld [vmem:[#allocation2 + $0x60] sm:$0xff]   ;;  %v866_v18 = vld [vmem:[#allocation2 + $0x28] sm:$0xff]   ;;  %v868_v20 = vld [vmem:[#allocation2 + $0x30] sm:$0xff]  }
  0x2d   :  { %783 = vmatprep.subr.bf16.mxu0 %v850_v2  ;;  %829 = vmatprep.subr.bf16.mxu1 %v850_v2  ;;  %v867_v19 = vld [vmem:[#allocation2 + $0x68] sm:$0xff]   ;;  %v869_v21 = vld [vmem:[#allocation2 + $0x70] sm:$0xff]   ;;  %v870_v22 = vld [vmem:[#allocation2 + $0x38] sm:$0xff]   ;;  %p924_p6 = pnand %p923_p5, %p917_p2 }
  0x2e   :  { %v871_v23 = vld [vmem:[#allocation2 + $0x78] sm:$0xff]  }
  0x30   :  { %784 = vmatpush3.bf16.msra.mxu0 %v850_v2  ;;  %837 = vmatpush3.bf16.msra.mxu1 %v850_v2 }
  0x31   :  { %785 = vmatprep.subr.bf16.mxu0 %v851_v3  ;;  %830 = vmatprep.subr.bf16.mxu1 %v851_v3 }
  0x34   :  { %786 = vmatpush3.bf16.msra.mxu0 %v851_v3  ;;  %838 = vmatpush3.bf16.msra.mxu1 %v851_v3 }
  0x35   :  { %787 = vmatprep.subr.bf16.mxu0 %v852_v6  ;;  %831 = vmatprep.subr.bf16.mxu1 %v852_v6 }
  0x38   :  { %788 = vmatpush3.bf16.msra.mxu0 %v852_v6  ;;  %839 = vmatpush3.bf16.msra.mxu1 %v852_v6 }
  0x39   :  { %789 = vmatprep.subr.bf16.mxu0 %v853_v7  ;;  %832 = vmatprep.subr.bf16.mxu1 %v853_v7 }
  0x3c   :  { %790 = vmatpush3.bf16.msra.mxu0 %v853_v7  ;;  %840 = vmatpush3.bf16.msra.mxu1 %v853_v7 }
  0x3d   :  { %791 = vmatprep.subr.bf16.mxu0 %v854_v8  ;;  %833 = vmatprep.subr.bf16.mxu1 %v854_v8 }
  0x40   :  { %792 = vmatpush3.bf16.msra.mxu0 %v854_v8  ;;  %841 = vmatpush3.bf16.msra.mxu1 %v854_v8 }
  0x41   :  { %793 = vmatprep.subr.bf16.mxu0 %v855_v9  ;;  %834 = vmatprep.subr.bf16.mxu1 %v855_v9 }
  0x44   :  { %794 = vmatpush3.bf16.msra.mxu0 %v855_v9  ;;  %842 = vmatpush3.bf16.msra.mxu1 %v855_v9 }
  0x47   :  { %796 = vmatmul.mubr.bf16.vlgmr.msra.gmra.mrb[0].mxu0 %v858_v10  ;;  %812 = vmatmul.mubr.bf16.vlgmr.msra.gmra.mrb[0].mxu1 %v859_v11 }
  0x48   :  { %799 = vmatprep.mubr.bf16.mxu0 %v860_v12  ;;  %815 = vmatprep.mubr.bf16.mxu1 %v861_v13 }
  0x4f   :  { %800 = vmatmul.mubr.bf16.gmra.mrb[4].mxu0 %v862_v14  ;;  %816 = vmatmul.mubr.bf16.gmra.mrb[4].mxu1 %v863_v15 }
  0x50   :  { %803 = vmatprep.mubr.bf16.mxu0 %v864_v16  ;;  %819 = vmatprep.mubr.bf16.mxu1 %v865_v17 }
  0x57   :  { %804 = vmatmul.mubr.bf16.gmra.mrb[8].mxu0 %v866_v18  ;;  %820 = vmatmul.mubr.bf16.gmra.mrb[8].mxu1 %v867_v19 }
  0x58   :  { %807 = vmatprep.mubr.bf16.mxu0 %v868_v20  ;;  %823 = vmatprep.mubr.bf16.mxu1 %v869_v21 }
  0x5f   :  { %808 = vmatmul.mubr.bf16.gmra.mrb[12].mxu0 %v870_v22  ;;  %824 = vmatmul.mubr.bf16.gmra.mrb[12].mxu1 %v871_v23 }
 0x11a   :  { %v797_v24 = vpop.f32.mrb[0].mxu0  ;;  %v813_v25 = vpop.f32.mrb[0].mxu1 }
 0x11b   :  { %v267_v26 = vpop.f32.mrb[1].mxu0  ;;  %v331_v27 = vpop.f32.mrb[1].mxu1 }
 0x11c   :  { %v798_v28 = vpop.f32.mrb[2].mxu0  ;;  %v814_v29 = vpop.f32.mrb[2].mxu1 }
 0x11d   :  { %v668_v30 = vpack.c.bf16 %v798_v28, %v797_v24  ;;  %v708_v31 = vpack.c.bf16 %v814_v29, %v813_v25  ;;  %v270_v32 = vpop.f32.mrb[3].mxu0  ;;  %v334_v33 = vpop.f32.mrb[3].mxu1 }
 0x11e   :  { %v663_v34 = vpack.c.bf16 %v270_v32, %v267_v26  ;;  %v703_v35 = vpack.c.bf16 %v334_v33, %v331_v27 }
 0x11f   :  { %740 = vst [vmem:[#allocation7 + $0x8] sm:$0xff] %v668_v30   ;;  %748 = vst [vmem:[#allocation7 + $0x48] sm:$0xff] %v708_v31  }
 0x120   :  { %664 = vst [vmem:[#allocation7] sm:$0xff] %v663_v34   ;;  %747 = vst [vmem:[#allocation7 + $0x40] sm:$0xff] %v703_v35  }
 0x122   :  { %v801_v36 = vpop.f32.mrb[4].mxu0  ;;  %v817_v37 = vpop.f32.mrb[4].mxu1 }
 0x123   :  { %v283_v38 = vpop.f32.mrb[5].mxu0  ;;  %v347_v39 = vpop.f32.mrb[5].mxu1 }
 0x124   :  { %v802_v40 = vpop.f32.mrb[6].mxu0  ;;  %v818_v41 = vpop.f32.mrb[6].mxu1 }
 0x125   :  { %v678_v42 = vpack.c.bf16 %v802_v40, %v801_v36  ;;  %v718_v43 = vpack.c.bf16 %v818_v41, %v817_v37  ;;  %v286_v44 = vpop.f32.mrb[7].mxu0  ;;  %v350_v45 = vpop.f32.mrb[7].mxu1 }
 0x126   :  { %v673_v46 = vpack.c.bf16 %v286_v44, %v283_v38  ;;  %v713_v47 = vpack.c.bf16 %v350_v45, %v347_v39 }
 0x127   :  { %742 = vst [vmem:[#allocation7 + $0x18] sm:$0xff] %v678_v42   ;;  %750 = vst [vmem:[#allocation7 + $0x58] sm:$0xff] %v718_v43  }
 0x128   :  { %741 = vst [vmem:[#allocation7 + $0x10] sm:$0xff] %v673_v46   ;;  %749 = vst [vmem:[#allocation7 + $0x50] sm:$0xff] %v713_v47  }
 0x12a   :  { %v805_v48 = vpop.f32.mrb[8].mxu0  ;;  %v821_v49 = vpop.f32.mrb[8].mxu1 }
 0x12b   :  { %v299_v50 = vpop.f32.mrb[9].mxu0  ;;  %v363_v51 = vpop.f32.mrb[9].mxu1 }
 0x12c   :  { %v806_v52 = vpop.f32.mrb[10].mxu0  ;;  %v822_v53 = vpop.f32.mrb[10].mxu1 }
 0x12d   :  { %v688_v54 = vpack.c.bf16 %v806_v52, %v805_v48  ;;  %v728_v55 = vpack.c.bf16 %v822_v53, %v821_v49  ;;  %v302_v56 = vpop.f32.mrb[11].mxu0  ;;  %v366_v57 = vpop.f32.mrb[11].mxu1 }
 0x12e   :  { %v683_v58 = vpack.c.bf16 %v302_v56, %v299_v50  ;;  %v723_v59 = vpack.c.bf16 %v366_v57, %v363_v51 }
 0x12f   :  { %744 = vst [vmem:[#allocation7 + $0x28] sm:$0xff] %v688_v54   ;;  %752 = vst [vmem:[#allocation7 + $0x68] sm:$0xff] %v728_v55  }
 0x130   :  { %743 = vst [vmem:[#allocation7 + $0x20] sm:$0xff] %v683_v58   ;;  %751 = vst [vmem:[#allocation7 + $0x60] sm:$0xff] %v723_v59  }
 0x132   :  { %v809_v60 = vpop.f32.mrb[12].mxu0  ;;  %v825_v61 = vpop.f32.mrb[12].mxu1 }
 0x133   :  { %v315_v62 = vpop.f32.mrb[13].mxu0  ;;  %v379_v63 = vpop.f32.mrb[13].mxu1 }
 0x134   :  { %v810_v0 = vpop.f32.mrb[14].mxu0  ;;  %v826_v1 = vpop.f32.mrb[14].mxu1 }
 0x135   :  { %v698_v2 = vpack.c.bf16 %v810_v0, %v809_v60  ;;  %v738_v3 = vpack.c.bf16 %v826_v1, %v825_v61  ;;  %v318_v4 = vpop.f32.mrb[15].mxu0  ;;  %v382_v5 = vpop.f32.mrb[15].mxu1 }
 0x136   :  { %v693_v6 = vpack.c.bf16 %v318_v4, %v315_v62  ;;  %v733_v7 = vpack.c.bf16 %v382_v5, %v379_v63 }
 0x137   :  { %746 = vst [vmem:[#allocation7 + $0x38] sm:$0xff] %v698_v2   ;;  %754 = vst [vmem:[#allocation7 + $0x78] sm:$0xff] %v738_v3  }
 0x138   :  { %745 = vst [vmem:[#allocation7 + $0x30] sm:$0xff] %v693_v6   ;;  %753 = vst [vmem:[#allocation7 + $0x70] sm:$0xff] %v733_v7  }
 0x139   :  { %927 = shalt.err (!%p924_p6)
}
 0x13a   :  { %s928_s10 = scalar_lea.hbm %s1011_s2, 2048 }
 0x13b   :  { %p929_p7 = scmp.ne.s32.totalorder %s1011_s2, %s928_s10  ;;  %p932_p8 = scmp.lt.u32.totalorder %s928_s10, %s1011_s2 }
 0x13d   :  { %p934_p9 = pnand %p932_p8, %p929_p7 }
 0x13f   :  { %937 = shalt.err (!%p934_p9)
}
 0x140   :  { %565 = dma.vmem_to_hbm [thread:$0]  %s560_s6, 2048, %s1011_s2, [#allocation4], %s945_s19, %s945_s19, %s946_s20  }
 0x141   :  { %942 = dma.done.wait [#allocation4], 2048  }
 0x142   :  { %943 = vsyncadd [#allocation4], 4294965248 }
 0x143   :  { %569 = vsyncpa [#allocation3], 1 }
 0x144   :  { %570 = vsyncpa [#allocation6], 1 }
 0x145   :  { %571 = vsyncpa [#allocation4], 1 }

</bundles_post_ra>
